<compile_context>
chip_gen: v6e
topology: v6e:2x2x1
jax: 0.10.0
libtpu: 0.0.40
codegen_flags: <defaults>
</compile_context>

<pallas_src>
import jax
import jax.numpy as jnp
from jax.experimental import pallas as pl
from jax.experimental.pallas import tpu as pltpu


LANE = 128      # TPU lane width (used only for the VMEM budget estimate)
MAX_TB = 4096   # max batch rows per grid step (amortizes ~600-cycle step cost)


def _round_up(n, m):
    return ((n + m - 1) // m) * m


def _sublane(dtype):
    # Sublane quantum depends on element width: f32 -> 8, bf16 -> 16, int8 -> 32.
    return 8 * (4 // jnp.dtype(dtype).itemsize)


def nest_mlp_kernel(x_ref, w_ref, b_ref, o_ref):
    # (tb, Din) @ (Din, Dout) on the MXU with f32 accumulation.
    y = jnp.dot(x_ref[...], w_ref[...], preferred_element_type=jnp.float32)
    # Bias is a single (1, Dout) row; implicit broadcast over the batch tile (VPU).
    y = y + b_ref[...]
    # ReLU on the VPU; single cast only at the final store.
    o_ref[...] = jnp.maximum(y, 0.0).astype(o_ref.dtype)


def _choose_tb(batch, sublane):
    tb = min(MAX_TB, _round_up(batch, sublane))
    # Guarantee >= 2 grid steps whenever the batch allows it, so the "parallel"
    # batch axis can be sharded across both v7x TensorCores (free on v5e/v6e).
    if pl.cdiv(batch, tb) < 2 and batch > sublane:
        tb = _round_up(pl.cdiv(batch, 2), sublane)
    return tb


def _vmem_budget_bytes(tb, din, dout, x_dtype, out_dtype):
    # Pipelined-buffer footprint with (8, 128) layout padding applied.
    x_b = jnp.dtype(x_dtype).itemsize
    o_b = jnp.dtype(out_dtype).itemsize
    din_p, dout_p = _round_up(din, LANE), _round_up(dout, LANE)
    used = (2 * tb * din_p * x_b                  # double-buffered x tiles
            + 2 * tb * dout_p * o_b               # double-buffered out tiles
            + _round_up(din, 8) * dout_p * x_b    # resident W
            + 8 * dout_p * x_b)                   # resident bias row
    # 2x headroom + 4 MiB slack, capped well below v7x's 64 MiB physical VMEM.
    return min(48 * 1024 * 1024, 2 * used + 4 * 1024 * 1024)


@jax.jit
def nest_mlp(x, w, b):
    """y = relu(x @ w + b).  x: (B, Din), w: (Din, Dout), b: (Dout,)."""
    B, Din = x.shape
    Din_w, Dout = w.shape
    assert Din == Din_w and b.shape == (Dout,)

    sublane = _sublane(x.dtype)
    tb = _choose_tb(B, sublane)
    grid = (pl.cdiv(B, tb),)          # partial last block handled by Pallas
    b2 = b.reshape(1, Dout)           # one bias row, broadcast in-kernel

    return pl.pallas_call(
        nest_mlp_kernel,
        out_shape=jax.ShapeDtypeStruct((B, Dout), x.dtype),
        grid=grid,
        in_specs=[
            # Batch-tiled x; last dim = full Din (K stays unpadded on purpose).
            pl.BlockSpec((tb, Din), lambda i: (i, 0)),
            # W / bias blocks equal the full arrays -> resident across steps.
            pl.BlockSpec((Din, Dout), lambda i: (0, 0)),
            pl.BlockSpec((1, Dout), lambda i: (0, 0)),
        ],
        # Natural-width output block: last dim equals the full array dim, so no
        # lane padding, no write amplification, no post-kernel column slice.
        out_specs=pl.BlockSpec((tb, Dout), lambda i: (i, 0)),
        compiler_params=pltpu.CompilerParams(
            dimension_semantics=("parallel",),   # batch tiles are independent
            vmem_limit_bytes=_vmem_budget_bytes(tb, Din, Dout, x.dtype, x.dtype),
        ),
    )(x, w, b2)


if __name__ == "__main__":
    key = jax.random.PRNGKey(0)
    kx, kw, kb = jax.random.split(key, 3)

    B, Din, Dout = 8, 40, 30   # shapes implied by nn.Linear(40, 30)

    # Deterministic parameter init (mimics PyTorch Linear U(-1/sqrt(in), 1/sqrt(in))).
    bound = 1.0 / jnp.sqrt(jnp.float32(Din))
    w = jax.random.uniform(kw, (Din, Dout), jnp.float32, -bound, bound)
    b = jax.random.uniform(kb, (Dout,), jnp.float32, -bound, bound)
    x = jax.random.normal(kx, (B, Din), jnp.float32)

    out = jax.block_until_ready(nest_mlp(x, w, b))
    ref = jnp.maximum(x @ w + b, 0.0)
    assert out.shape == (B, Dout)
    assert jnp.allclose(out, ref, atol=1e-5, rtol=1e-5)

    # Ragged batch: exercises the multi-step grid, the >=2-step megacore split,
    # and the masked partial last block (no x padding, no output slicing).
    B2 = 1030
    x2 = jax.random.normal(kx, (B2, Din), jnp.float32)
    out2 = jax.block_until_ready(nest_mlp(x2, w, b))
    ref2 = jnp.maximum(x2 @ w + b, 0.0)
    assert out2.shape == (B2, Dout)
    assert jnp.allclose(out2, ref2, atol=1e-4, rtol=1e-4)

    print("KERNEL_OK")
</pallas_src>

<mosaic_0001>
module attributes {stable_mosaic.version = 11 : i64} {
  func.func @nest_mlp_kernel(%arg0: i32, %arg1: memref<8x40xf32, #tpu.memory_space<vmem>>, %arg2: memref<40x30xf32, #tpu.memory_space<vmem>>, %arg3: memref<1x30xf32, #tpu.memory_space<vmem>>, %arg4: memref<8x30xf32, #tpu.memory_space<vmem>>) attributes {dimension_semantics = [#tpu.dimension_semantics<parallel>], iteration_bounds = array<i64: 1>, scalar_prefetch = 0 : i64, scratch_operands = 0 : i64, tpu.core_type = #tpu.core_type<tc>, window_params = [{transform_indices = @transform_0, window_bounds = array<i64: 8, 40>}, {pipeline_mode = #tpu.pipeline_mode<synchronous>, transform_indices = @transform_1, window_bounds = array<i64: 40, 30>}, {pipeline_mode = #tpu.pipeline_mode<synchronous>, transform_indices = @transform_2, window_bounds = array<i64: 1, 30>}, {transform_indices = @transform_3, window_bounds = array<i64: 8, 30>}]} {
    %c0 = arith.constant 0 : index
    %c0_0 = arith.constant 0 : index
    %0 = vector.load %arg1[%c0, %c0_0] : memref<8x40xf32, #tpu.memory_space<vmem>>, vector<8x40xf32>
    %c0_1 = arith.constant 0 : index
    %c0_2 = arith.constant 0 : index
    %1 = vector.load %arg2[%c0_1, %c0_2] : memref<40x30xf32, #tpu.memory_space<vmem>>, vector<40x30xf32>
    %cst = arith.constant dense<0.000000e+00> : vector<8x30xf32>
    %2 = tpu.matmul %0, %1, %cst {dimension_numbers = #tpu.dot_dimension_numbers<[1], [0], [0], [1], [0, 0, 1, 1], [], []>} : vector<8x40xf32>, vector<40x30xf32>, vector<8x30xf32> -> vector<8x30xf32>
    %c0_3 = arith.constant 0 : index
    %c0_4 = arith.constant 0 : index
    %3 = vector.load %arg3[%c0_3, %c0_4] : memref<1x30xf32, #tpu.memory_space<vmem>>, vector<1x30xf32>
    %4 = vector.broadcast %3 : vector<1x30xf32> to vector<8x30xf32>
    %5 = arith.addf %2, %4 : vector<8x30xf32>
    %cst_5 = arith.constant 0.000000e+00 : f32
    %6 = vector.broadcast %cst_5 : f32 to vector<8x30xf32>
    %7 = arith.maximumf %5, %6 : vector<8x30xf32>
    %c0_6 = arith.constant 0 : index
    %c0_7 = arith.constant 0 : index
    %8 = vector.load %arg4[%c0_6, %c0_7] : memref<8x30xf32, #tpu.memory_space<vmem>>, vector<8x30xf32>
    tpu.vector_store %arg4[%c0_6, %c0_7], %7 {strides = array<i32>} : memref<8x30xf32, #tpu.memory_space<vmem>>, vector<8x30xf32>,
    return
  }
  func.func @transform_0(%arg0: i32) -> (i32, i32) {
    %c0_i32 = arith.constant 0 : i32
    %c0_i32_0 = arith.constant 0 : i32
    return %arg0, %c0_i32 : i32, i32
  }
  func.func @transform_1(%arg0: i32) -> (i32, i32) {
    %c0_i32 = arith.constant 0 : i32
    %c0_i32_0 = arith.constant 0 : i32
    %c0_i32_1 = arith.constant 0 : i32
    return %c0_i32, %c0_i32_0 : i32, i32
  }
  func.func @transform_2(%arg0: i32) -> (i32, i32) {
    %c0_i32 = arith.constant 0 : i32
    %c0_i32_0 = arith.constant 0 : i32
    %c0_i32_1 = arith.constant 0 : i32
    return %c0_i32, %c0_i32_0 : i32, i32
  }
  func.func @transform_3(%arg0: i32) -> (i32, i32) {
    %c0_i32 = arith.constant 0 : i32
    %c0_i32_0 = arith.constant 0 : i32
    return %arg0, %c0_i32 : i32, i32
  }
}

</mosaic_0001>

<bundles_post_ra>
// kernel: nest_mlp.1
= control target key start
LH: loop header
LB: loop body
LE: loop exit
PB: predicated region body
PF: predicated region fallthrough
CT: control target
= control target key end

     0   :  { %v165_v1 = vmov 0.0   ;;  %vm166_vm0 = vmmov 0   ;;  %s212_s0 = inlined_call_operand.vmem [shape: f32[8,40], index: 0, kind: input, shape index: {}]   ;;  %s213_s1 = inlined_call_operand.vmem [shape: f32[40,30], index: 1, kind: input, shape index: {}]   ;;  %s214_s2 = inlined_call_operand.vmem [shape: f32[1,30], index: 2, kind: input, shape index: {}]   ;;  %s215_s3 = inlined_call_operand.hbm [shape: f32[8,30], index: 3, kind: output, shape index: {}]  }
   0x1   :  { %v20_v0 = vld [vmem:[%s213_s1 + $0x20] sm:$0xff]  ;;  %127 = vmatprep.subr.mxu0 %v165_v1  ;;  %v19_v2 = vld [vmem:[%s213_s1 + $0x18] sm:$0xff]  ;;  %137 = vmatprep.mubr.msk.f32.mxu0 %vm166_vm0, %v165_v1 }
   0x2   :  { %128 = vmatpush3.msra.mxu0 %v20_v0 }
   0x3   :  { %8 = vsyncpa [#allocation3], 0  ;;  %129 = vmatprep.subr.mxu0 %v165_v1  ;;  %v18_v3 = vld [vmem:[%s213_s1 + $0x10] sm:$0xff]  ;;  %v17_v4 = vld [vmem:[%s213_s1 + $0x8] sm:$0xff]  ;;  %vm28_vm1 = vcmask 326656   ;;  %s167_s26 = smov [#allocation2]  }
   0x4   :  { %130 = vmatpush3.msra.mxu0 %v19_v2  ;;  %v16_v5 = vld [vmem:[%s213_s1] sm:$0xff]  ;;  %s111_s27 = sshll.u32 %s167_s26, 4  ;;  %vm103_vm2 = vcmask 244736   ;;  %s112_s27 = int_to_ptr.vmem [resolvable:$true] %s111_s27 }
   0x5   :  { %131 = vmatprep.subr.mxu0 %v165_v1  ;;  %v15_v6 = vld [vmem:[%s212_s0] sm:$0xff]  ;;  %s143_s1 = scalar_lea.vmem %s112_s27, 128  ;;  %p148_p1 = scmp.lt.s32.totalorder %s112_s27, %s112_s27 }
   0x6   :  { %132 = vmatpush3.msra.mxu0 %v18_v3  ;;  %v119_v7 = vld [vmem:[%s214_s2] ss:$0 sm:$0xff]  ;;  %p144_p0 = scmp.ne.s32.totalorder %s112_s27, %s143_s1  ;;  %p149_p2 = scmp.lt.s32.totalorder %s143_s1, %s143_s1 }
   0x7   :  { %133 = vmatprep.subr.mxu0 %v165_v1 }
   0x8   :  { %134 = vmatpush3.msra.mxu0 %v17_v4  ;;  %p150_p3 = por %p149_p2, %p148_p1 }
   0x9   :  { %135 = vmatprep.subr.mxu0 %v165_v1 }
   0xa   :  { %136 = vmatpush3.msra.mxu0 %v16_v5  ;;  %p151_p4 = pnand %p150_p3, %p144_p0 }
   0xb   :  { %138 = vmatmul.mubr.msk.f32.vlgmr.msra.gmra.mxu0 %vm28_vm1, %v15_v6 }
  0xcb   :  { %v98_v8 = vpop.f32.mrf.mxu0 }
  0xcc   :  { %v99_v9 = vadd.f32 %v119_v7, %v98_v8 }
  0xcd   :  { %v139_v10 = vpop.f32.mrf.mxu0 }
  0xce   :  { %v102_v11 = vmax.f32 %v99_v9, 0.0 }
  0xd0   :  { %104 = vst.msk [vmem:[#allocation2] sm:$0xff] %vm103_vm2, %v102_v11 }
  0xd1   :  { %154 = shalt.err (!%p151_p4)
}
  0xd2   :  { %114 = dma.vmem_to_hbm [thread:$0]  %s112_s27, 128, %s215_s3, [#allocation3]  }
  0xd3   :  { %163 = dma.done.wait [#allocation3], 128  }
  0xd4   :  { %164 = vsyncadd [#allocation3], 4294967168 }
  0xd5   :  { %118 = vsyncpa [#allocation3], 1 }

</bundles_post_ra>
